<compile_context>
chip_gen: v5e
topology: v5e:2x2
jax: 0.10.0
libtpu: 0.0.40
codegen_flags: <defaults>
</compile_context>

<pallas_src>
import functools

import jax
import jax.numpy as jnp
from jax.experimental import pallas as pl
from jax.experimental.pallas import tpu as pltpu


N_OUT_PAD = 128   # final linear padded to 128 lanes -> single unmasked lane-dense store
C_PAD = 128       # conv output channels padded to 128 -> lane-dense pooling / head
K_PAD = 32        # im2col K (3*3*3 = 27) + constant-1 bias column, padded to 32 lanes


# -----------------------------------------------------------------------------
# Fused kernel: conv3x3 (pre-built im2col patches -> one bf16 MXU GEMM, bias
# folded into the weight) + ReLU -> AdaptiveConcatPool2d -> head (BN folded into
# the Linears, tab branch + b1 folded into a per-row bias).
# One grid step processes `block_b` images end to end.
# -----------------------------------------------------------------------------
def _fused_kernel(patches_ref, wk_ref, hbias_ref, w1m_ref, w1a_ref,
                  w2_ref, b2_ref, o_ref, *, block_b, n_pix):
    # Body: (block_b*H*W, K_PAD) bf16  x  (K_PAD, C_PAD) bf16 -> f32 acc, + ReLU.
    act = jnp.dot(patches_ref[...], wk_ref[...], preferred_element_type=jnp.float32)
    act = jnp.maximum(act, 0.0)                               # f32 VPU (v5e-safe)
    act = act.reshape(block_b, n_pix, C_PAD)

    # AdaptiveConcatPool2d (max | avg over spatial) on lane-dense 128-wide vregs.
    mx = jnp.max(act, axis=1)                                 # (block_b, C_PAD)
    avg = jnp.sum(act, axis=1) * (1.0 / n_pix)

    # Head: feats = [max | avg | tab]  ==>  mx @ W1m + avg @ W1a + (tab @ W1t + b1')
    # (BN1d folded into W1/W2 in the wrapper; hbias carries the tab + b1 part).
    h = (jnp.dot(mx.astype(jnp.bfloat16), w1m_ref[...], preferred_element_type=jnp.float32)
         + jnp.dot(avg.astype(jnp.bfloat16), w1a_ref[...], preferred_element_type=jnp.float32)
         + hbias_ref[...])
    h = jnp.maximum(h, 0.0)
    o_ref[...] = (jnp.dot(h.astype(jnp.bfloat16), w2_ref[...],
                          preferred_element_type=jnp.float32) + b2_ref[...])


# -----------------------------------------------------------------------------
# Pure-XLA glue: im2col patches, BN / bias / tab folding, lane padding.
# -----------------------------------------------------------------------------
def _prepare_operands(params, img, tab_list):
    B, c_in, H, W = img.shape
    KH, KW, _, c_out = params["conv_w"].shape
    hidden = params["w1"].shape[1]
    n_out = params["w2"].shape[1]
    K = KH * KW * c_in
    assert KH % 2 == 1 and KW % 2 == 1, "SAME padding assumes odd kernel size"
    assert K + 1 <= K_PAD and c_out <= C_PAD and n_out <= N_OUT_PAD

    # --- im2col in the wrapper (9 shifted views) + constant-1 bias column ---
    ph, pw = KH // 2, KW // 2
    x = jnp.transpose(img, (0, 2, 3, 1)).astype(jnp.float32)       # NCHW -> NHWC
    xp = jnp.pad(x, ((0, 0), (ph, ph), (pw, pw), (0, 0)))
    cols = [xp[:, dy:dy + H, dx:dx + W, :] for dy in range(KH) for dx in range(KW)]
    patches = jnp.concatenate(cols, axis=-1).reshape(B * H * W, K)
    patches = jnp.concatenate(
        [patches,
         jnp.ones((B * H * W, 1), jnp.float32),                    # bias column
         jnp.zeros((B * H * W, K_PAD - K - 1), jnp.float32)], axis=-1)
    patches = patches.astype(jnp.bfloat16)                         # (B*H*W, K_PAD)

    # --- conv weight + bias folded into one (K_PAD, C_PAD) bf16 GEMM RHS ---
    wk = jnp.zeros((K_PAD, C_PAD), jnp.float32)
    wk = wk.at[:K, :c_out].set(params["conv_w"].reshape(K, c_out))
    wk = wk.at[K, :c_out].set(params["conv_b"][0])                 # bias row
    wk = wk.astype(jnp.bfloat16)

    # --- head: fold BN1 into W1 / b1, split W1 over [max | avg | tab] rows ---
    w1p = params["s1"][0][:, None] * params["w1"]                  # (F, hidden)
    b1f = params["t1"][0] @ params["w1"] + params["b1"][0]         # (hidden,)
    w1m = jnp.zeros((C_PAD, hidden), jnp.float32).at[:c_out].set(w1p[:c_out])
    w1a = jnp.zeros((C_PAD, hidden), jnp.float32).at[:c_out].set(w1p[c_out:2 * c_out])
    if tab_list:
        tab_arr = jnp.stack(tab_list, axis=1).astype(jnp.float32)  # torch.stack(tab, axis=1)
        hbias = tab_arr @ w1p[2 * c_out:] + b1f                    # (B, hidden) per-row bias
    else:
        hbias = jnp.broadcast_to(b1f[None, :], (B, hidden))
    w1m = w1m.astype(jnp.bfloat16)
    w1a = w1a.astype(jnp.bfloat16)

    # --- fold BN2 into W2 / b2, pad to 128 output lanes ---
    w2f = params["s2"][0][:, None] * params["w2"]
    b2f = params["t2"][0] @ params["w2"] + params["b2"][0]
    w2p = jnp.zeros((hidden, N_OUT_PAD), jnp.float32).at[:, :n_out].set(w2f).astype(jnp.bfloat16)
    b2p = jnp.zeros((1, N_OUT_PAD), jnp.float32).at[:, :n_out].set(b2f)

    return dict(patches=patches, wk=wk, hbias=hbias.astype(jnp.float32),
                w1m=w1m, w1a=w1a, w2p=w2p, b2p=b2p,
                B=B, H=H, W=W, hidden=hidden, n_out=n_out)


# -----------------------------------------------------------------------------
# MultiInputModel.forward — one fused pallas_call
# -----------------------------------------------------------------------------
def multi_input_forward(params, img, *tab):
    ops = _prepare_operands(params, img, list(tab))
    B, H, W = ops["B"], ops["H"], ops["W"]
    hidden, n_out = ops["hidden"], ops["n_out"]
    n_pix = H * W

    # Work-aware grid split: 2 "parallel" steps (one per v7x TensorCore) only when
    # the per-core GEMM M dimension is big enough to pay for the duplicated weight
    # DMAs and the sub-batch stays sublane-aligned.  Otherwise a single step —
    # on single-TC v5e/v6e a 2-step grid would just serialize and double overhead.
    n_blocks = 2 if (B % 2 == 0 and (B // 2) % 8 == 0 and (B // 2) * n_pix >= 1024) else 1
    block_b = B // n_blocks
    rows = block_b * n_pix

    kernel = functools.partial(_fused_kernel, block_b=block_b, n_pix=n_pix)
    const = lambda b: (0, 0)   # VMEM-resident weights: constant index_map

    out = pl.pallas_call(
        kernel,
        out_shape=jax.ShapeDtypeStruct((B, N_OUT_PAD), jnp.float32),
        grid=(n_blocks,),
        in_specs=[
            pl.BlockSpec((rows, K_PAD), lambda b: (b, 0)),         # im2col patches
            pl.BlockSpec((K_PAD, C_PAD), const),                   # conv weight (+bias row)
            pl.BlockSpec((block_b, hidden), lambda b: (b, 0)),     # per-row head bias (tab + b1)
            pl.BlockSpec((C_PAD, hidden), const),                  # W1 (max rows)
            pl.BlockSpec((C_PAD, hidden), const),                  # W1 (avg rows)
            pl.BlockSpec((hidden, N_OUT_PAD), const),              # W2
            pl.BlockSpec((1, N_OUT_PAD), const),                   # b2
        ],
        out_specs=pl.BlockSpec((block_b, N_OUT_PAD), lambda b: (b, 0)),
        compiler_params=pltpu.CompilerParams(dimension_semantics=("parallel",)),
    )(ops["patches"], ops["wk"], ops["hbias"], ops["w1m"], ops["w1a"],
      ops["w2p"], ops["b2p"])

    return out[:, :n_out]


# -----------------------------------------------------------------------------
# Deterministic parameter construction (synthetic, no checkpoint load)
# -----------------------------------------------------------------------------
def _fold_bn(gamma, beta, mean, var, eps=1e-5):
    s = gamma / jnp.sqrt(var + eps)
    t = beta - mean * s
    return s[None, :], t[None, :]


def init_params(key, *, c_in=3, c_out=16, n_additional=4, hidden=64, n_out=5):
    ks = jax.random.split(key, 12)
    conv_w = jax.random.normal(ks[0], (3, 3, c_in, c_out), jnp.float32) * jnp.sqrt(2.0 / (3 * 3 * c_in))
    conv_b = 0.01 * jax.random.normal(ks[1], (1, c_out), jnp.float32)

    F = 2 * c_out + n_additional
    g1 = 1.0 + 0.1 * jax.random.normal(ks[2], (F,), jnp.float32)
    be1 = 0.1 * jax.random.normal(ks[3], (F,), jnp.float32)
    m1 = 0.1 * jax.random.normal(ks[4], (F,), jnp.float32)
    v1 = 0.5 + jax.random.uniform(ks[5], (F,), jnp.float32)
    s1, t1 = _fold_bn(g1, be1, m1, v1)
    w1 = jax.random.normal(ks[6], (F, hidden), jnp.float32) * jnp.sqrt(2.0 / F)  # kaiming_normal
    b1 = jnp.zeros((1, hidden), jnp.float32)

    g2 = 1.0 + 0.1 * jax.random.normal(ks[7], (hidden,), jnp.float32)
    be2 = 0.1 * jax.random.normal(ks[8], (hidden,), jnp.float32)
    m2 = 0.1 * jax.random.normal(ks[9], (hidden,), jnp.float32)
    v2 = 0.5 + jax.random.uniform(ks[10], (hidden,), jnp.float32)
    s2, t2 = _fold_bn(g2, be2, m2, v2)
    w2 = jax.random.normal(ks[11], (hidden, n_out), jnp.float32) * jnp.sqrt(2.0 / hidden)
    b2 = jnp.zeros((1, n_out), jnp.float32)

    return dict(conv_w=conv_w, conv_b=conv_b, s1=s1, t1=t1, w1=w1, b1=b1,
                s2=s2, t2=t2, w2=w2, b2=b2)


# -----------------------------------------------------------------------------
# References for validation
# -----------------------------------------------------------------------------
def reference_forward_f32(params, img, *tab):
    """Module-faithful pure-f32 reference (no folding, no bf16)."""
    x = jnp.transpose(img, (0, 2, 3, 1)).astype(jnp.float32)
    y = jax.lax.conv_general_dilated(x, params["conv_w"], (1, 1), "SAME",
                                     dimension_numbers=("NHWC", "HWIO", "NHWC"))
    y = jnp.maximum(y + params["conv_b"][0], 0.0)
    feats = [jnp.max(y, axis=(1, 2)), jnp.mean(y, axis=(1, 2))]
    if tab:
        feats.append(jnp.stack(tab, axis=1))
    feats = jnp.concatenate(feats, axis=1)
    h = feats * params["s1"] + params["t1"]
    h = jnp.maximum(h @ params["w1"] + params["b1"], 0.0)
    h = h * params["s2"] + params["t2"]
    return h @ params["w2"] + params["b2"]


def structural_reference(params, img, *tab):
    """Same folded / bf16-rounded operands as the kernel, computed with plain jnp
    ops — isolates the Pallas plumbing (BlockSpecs / grid / stores) for a tight check."""
    ops = _prepare_operands(params, img, list(tab))
    B, n_pix, n_out = ops["B"], ops["H"] * ops["W"], ops["n_out"]
    act = jnp.maximum(jnp.dot(ops["patches"], ops["wk"],
                              preferred_element_type=jnp.float32), 0.0)
    act = act.reshape(B, n_pix, C_PAD)
    mx, avg = jnp.max(act, axis=1), jnp.sum(act, axis=1) * (1.0 / n_pix)
    h = (jnp.dot(mx.astype(jnp.bfloat16), ops["w1m"], preferred_element_type=jnp.float32)
         + jnp.dot(avg.astype(jnp.bfloat16), ops["w1a"], preferred_element_type=jnp.float32)
         + ops["hbias"])
    h = jnp.maximum(h, 0.0)
    out = jnp.dot(h.astype(jnp.bfloat16), ops["w2p"],
                  preferred_element_type=jnp.float32) + ops["b2p"]
    return out[:, :n_out]


if __name__ == "__main__":
    key = jax.random.PRNGKey(0)
    kp, ki, k1, k2, k3, k4 = jax.random.split(key, 6)
    params = init_params(kp)                                     # n_in=3, nf_body=16, n_additional=4, n_out=5
    img = jax.random.normal(ki, (2, 3, 16, 16), jnp.float32)     # NCHW, as the PyTorch module expects
    tab = [jax.random.normal(k, (2,), jnp.float32) for k in (k1, k2, k3, k4)]

    fwd = jax.jit(multi_input_forward)
    out = jax.block_until_ready(fwd(params, img, *tab))
    assert out.shape == (2, 5), out.shape

    # Tight check: kernel vs an identical-operand JAX computation (validates the
    # Pallas grid / BlockSpecs / GEMMs / pooling / store bit-closely).
    ref_s = structural_reference(params, img, *tab)
    assert bool(jnp.allclose(out, ref_s, rtol=2e-3, atol=2e-3)), \
        "Pallas output mismatch vs structural (same-operand) reference"

    # Sanity check: the BN/bias/tab folding algebra vs the module-faithful f32
    # reference (loose tolerance absorbs the kernel's bf16 GEMM operands).
    ref_f = reference_forward_f32(params, img, *tab)
    assert bool(jnp.allclose(out, ref_f, rtol=5e-2, atol=1e-1)), \
        "Pallas output mismatch vs f32 module reference"

    print("KERNEL_OK")
</pallas_src>

<mosaic_0001>
module attributes {stable_mosaic.version = 11 : i64} {
  func.func @_fused_kernel(%arg0: i32, %arg1: memref<512x32xbf16, #tpu.memory_space<vmem>>, %arg2: memref<32x128xbf16, #tpu.memory_space<vmem>>, %arg3: memref<2x64xf32, #tpu.memory_space<vmem>>, %arg4: memref<128x64xbf16, #tpu.memory_space<vmem>>, %arg5: memref<128x64xbf16, #tpu.memory_space<vmem>>, %arg6: memref<64x128xbf16, #tpu.memory_space<vmem>>, %arg7: memref<1x128xf32, #tpu.memory_space<vmem>>, %arg8: memref<2x128xf32, #tpu.memory_space<vmem>>) attributes {dimension_semantics = [#tpu.dimension_semantics<parallel>], iteration_bounds = array<i64: 1>, scalar_prefetch = 0 : i64, scratch_operands = 0 : i64, tpu.core_type = #tpu.core_type<tc>, window_params = [{transform_indices = @transform_0, window_bounds = array<i64: 512, 32>}, {pipeline_mode = #tpu.pipeline_mode<synchronous>, transform_indices = @transform_1, window_bounds = array<i64: 32, 128>}, {transform_indices = @transform_2, window_bounds = array<i64: 2, 64>}, {pipeline_mode = #tpu.pipeline_mode<synchronous>, transform_indices = @transform_3, window_bounds = array<i64: 128, 64>}, {pipeline_mode = #tpu.pipeline_mode<synchronous>, transform_indices = @transform_4, window_bounds = array<i64: 128, 64>}, {pipeline_mode = #tpu.pipeline_mode<synchronous>, transform_indices = @transform_5, window_bounds = array<i64: 64, 128>}, {pipeline_mode = #tpu.pipeline_mode<synchronous>, transform_indices = @transform_6, window_bounds = array<i64: 1, 128>}, {transform_indices = @transform_7, window_bounds = array<i64: 2, 128>}]} {
    %c0 = arith.constant 0 : index
    %c0_0 = arith.constant 0 : index
    %0 = vector.load %arg1[%c0, %c0_0] : memref<512x32xbf16, #tpu.memory_space<vmem>>, vector<512x32xbf16>
    %c0_1 = arith.constant 0 : index
    %c0_2 = arith.constant 0 : index
    %1 = vector.load %arg2[%c0_1, %c0_2] : memref<32x128xbf16, #tpu.memory_space<vmem>>, vector<32x128xbf16>
    %cst = arith.constant dense<0.000000e+00> : vector<512x128xf32>
    %2 = tpu.matmul %0, %1, %cst {dimension_numbers = #tpu.dot_dimension_numbers<[1], [0], [0], [1], [0, 0, 1, 1], [], []>} : vector<512x32xbf16>, vector<32x128xbf16>, vector<512x128xf32> -> vector<512x128xf32>
    %cst_3 = arith.constant 0.000000e+00 : f32
    %3 = vector.broadcast %cst_3 : f32 to vector<512x128xf32>
    %4 = arith.maximumf %2, %3 : vector<512x128xf32>
    %5 = vector.shape_cast %4 : vector<512x128xf32> to vector<2x256x128xf32>
    %cst_4 = arith.constant dense<0xFF800000> : vector<2x128xf32>
    %6 = vector.multi_reduction <maximumf>, %5, %cst_4 [1] : vector<2x256x128xf32> to vector<2x128xf32>
    %cst_5 = arith.constant dense<0.000000e+00> : vector<2x128xf32>
    %7 = vector.multi_reduction <add>, %5, %cst_5 [1] : vector<2x256x128xf32> to vector<2x128xf32>
    %cst_6 = arith.constant 3.906250e-03 : f32
    %8 = vector.broadcast %cst_6 : f32 to vector<2x128xf32>
    %9 = arith.mulf %7, %8 : vector<2x128xf32>
    %10 = arith.truncf %6 : vector<2x128xf32> to vector<2x128xbf16>
    %c0_7 = arith.constant 0 : index
    %c0_8 = arith.constant 0 : index
    %11 = vector.load %arg4[%c0_7, %c0_8] : memref<128x64xbf16, #tpu.memory_space<vmem>>, vector<128x64xbf16>
    %cst_9 = arith.constant dense<0.000000e+00> : vector<2x64xf32>
    %12 = tpu.matmul %10, %11, %cst_9 {dimension_numbers = #tpu.dot_dimension_numbers<[1], [0], [0], [1], [0, 0, 1, 1], [], []>} : vector<2x128xbf16>, vector<128x64xbf16>, vector<2x64xf32> -> vector<2x64xf32>
    %13 = arith.truncf %9 : vector<2x128xf32> to vector<2x128xbf16>
    %c0_10 = arith.constant 0 : index
    %c0_11 = arith.constant 0 : index
    %14 = vector.load %arg5[%c0_10, %c0_11] : memref<128x64xbf16, #tpu.memory_space<vmem>>, vector<128x64xbf16>
    %cst_12 = arith.constant dense<0.000000e+00> : vector<2x64xf32>
    %15 = tpu.matmul %13, %14, %cst_12 {dimension_numbers = #tpu.dot_dimension_numbers<[1], [0], [0], [1], [0, 0, 1, 1], [], []>} : vector<2x128xbf16>, vector<128x64xbf16>, vector<2x64xf32> -> vector<2x64xf32>
    %16 = arith.addf %12, %15 : vector<2x64xf32>
    %c0_13 = arith.constant 0 : index
    %c0_14 = arith.constant 0 : index
    %17 = vector.load %arg3[%c0_13, %c0_14] : memref<2x64xf32, #tpu.memory_space<vmem>>, vector<2x64xf32>
    %18 = arith.addf %16, %17 : vector<2x64xf32>
    %cst_15 = arith.constant 0.000000e+00 : f32
    %19 = vector.broadcast %cst_15 : f32 to vector<2x64xf32>
    %20 = arith.maximumf %18, %19 : vector<2x64xf32>
    %21 = arith.truncf %20 : vector<2x64xf32> to vector<2x64xbf16>
    %c0_16 = arith.constant 0 : index
    %c0_17 = arith.constant 0 : index
    %22 = vector.load %arg6[%c0_16, %c0_17] : memref<64x128xbf16, #tpu.memory_space<vmem>>, vector<64x128xbf16>
    %cst_18 = arith.constant dense<0.000000e+00> : vector<2x128xf32>
    %23 = tpu.matmul %21, %22, %cst_18 {dimension_numbers = #tpu.dot_dimension_numbers<[1], [0], [0], [1], [0, 0, 1, 1], [], []>} : vector<2x64xbf16>, vector<64x128xbf16>, vector<2x128xf32> -> vector<2x128xf32>
    %c0_19 = arith.constant 0 : index
    %c0_20 = arith.constant 0 : index
    %24 = vector.load %arg7[%c0_19, %c0_20] : memref<1x128xf32, #tpu.memory_space<vmem>>, vector<1x128xf32>
    %25 = vector.broadcast %24 : vector<1x128xf32> to vector<2x128xf32>
    %26 = arith.addf %23, %25 : vector<2x128xf32>
    %c0_21 = arith.constant 0 : index
    %c0_22 = arith.constant 0 : index
    %27 = vector.load %arg8[%c0_21, %c0_22] : memref<2x128xf32, #tpu.memory_space<vmem>>, vector<2x128xf32>
    tpu.vector_store %arg8[%c0_21, %c0_22], %26 {strides = array<i32>} : memref<2x128xf32, #tpu.memory_space<vmem>>, vector<2x128xf32>,
    return
  }
  func.func @transform_0(%arg0: i32) -> (i32, i32) {
    %c0_i32 = arith.constant 0 : i32
    %c0_i32_0 = arith.constant 0 : i32
    return %arg0, %c0_i32 : i32, i32
  }
  func.func @transform_1(%arg0: i32) -> (i32, i32) {
    %c0_i32 = arith.constant 0 : i32
    %c0_i32_0 = arith.constant 0 : i32
    %c0_i32_1 = arith.constant 0 : i32
    return %c0_i32, %c0_i32_0 : i32, i32
  }
  func.func @transform_2(%arg0: i32) -> (i32, i32) {
    %c0_i32 = arith.constant 0 : i32
    %c0_i32_0 = arith.constant 0 : i32
    return %arg0, %c0_i32 : i32, i32
  }
  func.func @transform_3(%arg0: i32) -> (i32, i32) {
    %c0_i32 = arith.constant 0 : i32
    %c0_i32_0 = arith.constant 0 : i32
    %c0_i32_1 = arith.constant 0 : i32
    return %c0_i32, %c0_i32_0 : i32, i32
  }
  func.func @transform_4(%arg0: i32) -> (i32, i32) {
    %c0_i32 = arith.constant 0 : i32
    %c0_i32_0 = arith.constant 0 : i32
    %c0_i32_1 = arith.constant 0 : i32
    return %c0_i32, %c0_i32_0 : i32, i32
  }
  func.func @transform_5(%arg0: i32) -> (i32, i32) {
    %c0_i32 = arith.constant 0 : i32
    %c0_i32_0 = arith.constant 0 : i32
    %c0_i32_1 = arith.constant 0 : i32
    return %c0_i32, %c0_i32_0 : i32, i32
  }
  func.func @transform_6(%arg0: i32) -> (i32, i32) {
    %c0_i32 = arith.constant 0 : i32
    %c0_i32_0 = arith.constant 0 : i32
    %c0_i32_1 = arith.constant 0 : i32
    return %c0_i32, %c0_i32_0 : i32, i32
  }
  func.func @transform_7(%arg0: i32) -> (i32, i32) {
    %c0_i32 = arith.constant 0 : i32
    %c0_i32_0 = arith.constant 0 : i32
    return %arg0, %c0_i32 : i32, i32
  }
}

</mosaic_0001>

<bundles_post_ra>
// kernel: multi_input_forward.1
= control target key start
LH: loop header
LB: loop body
LE: loop exit
PB: predicated region body
PF: predicated region fallthrough
CT: control target
= control target key end

     0   :  { %s1891_s0 = inlined_call_operand.vmem [shape: bf16[512,32], index: 0, kind: input, shape index: {}]   ;;  %s1892_s1 = inlined_call_operand.vmem [shape: bf16[32,128], index: 1, kind: input, shape index: {}]   ;;  %s1893_s2 = inlined_call_operand.vmem [shape: f32[2,64], index: 2, kind: input, shape index: {}]   ;;  %s1894_s3 = inlined_call_operand.vmem [shape: bf16[128,64], index: 3, kind: input, shape index: {}]   ;;  %s1895_s4 = inlined_call_operand.vmem [shape: bf16[128,64], index: 4, kind: input, shape index: {}]   ;;  %s1896_s5 = inlined_call_operand.vmem [shape: bf16[64,128], index: 5, kind: input, shape index: {}]   ;;  %s1897_s6 = inlined_call_operand.vmem [shape: f32[1,128], index: 6, kind: input, shape index: {}]   ;;  %s1898_s7 = inlined_call_operand.hbm [shape: f32[2,128], index: 7, kind: output, shape index: {}]  }
   0x1   :  { %v1277_v0 = vld [vmem:[%s1892_s1 + $0x8] sm:$0xff]  ;;  %v1276_v1 = vld [vmem:[%s1892_s1] sm:$0xff] }
   0x2   :  { %371 = vmatpush.bf16.msra.mxu0 %v1277_v0  ;;  %1298 = vmatpush.bf16.msra.mxu1 %v1277_v0 }
   0x3   :  { %1300 = vmatpush.bf16.msra.mxu3 %v1277_v0  ;;  %1299 = vmatpush.bf16.msra.mxu2 %v1277_v0 }
   0x4   :  { %12 = vsyncpa [#allocation3], 0  ;;  %v1244_v2 = vld [vmem:[%s1891_s0] sm:$0xff]  ;;  %v1254_v3 = vld [vmem:[%s1891_s0 + $0x50] sm:$0xff]  ;;  %vm268_vm0 = vcmask 261120   ;;  %vm788_vm1 = vcmask 1041409  }
   0x5   :  { %v1267_v4 = vld [vmem:[%s1891_s0 + $0xb8] sm:$0xff]  ;;  %v1262_v5 = vld [vmem:[%s1891_s0 + $0x90] sm:$0xff]  ;;  %v1245_v6 = vld [vmem:[%s1891_s0 + $0x8] sm:$0xff]  ;;  %vm961_vm2 = vcmask 523264   ;;  %s1332_s11 = smov [#allocation2]   ;;  %s986_s15 = sshll.u32 %s1898_s7, 4  ;;  %s987_s15 = int_to_ptr.hbm [resolvable:$true] %s986_s15 }
   0x6   :  { %372 = vmatpush.bf16.msra.mxu0 %v1276_v1  ;;  %1301 = vmatpush.bf16.msra.mxu1 %v1276_v1  ;;  %v1255_v7 = vld [vmem:[%s1891_s0 + $0x58] sm:$0xff]  ;;  %v1268_v8 = vld [vmem:[%s1891_s0 + $0xc0] sm:$0xff]  ;;  %v1246_v10 = vld [vmem:[%s1891_s0 + $0x10] sm:$0xff]  ;;  %s984_s12 = sshll.u32 %s1332_s11, 4  ;;  %s985_s12 = int_to_ptr.vmem [resolvable:$true] %s984_s12 }
   0x7   :  { %1303 = vmatpush.bf16.msra.mxu3 %v1276_v1  ;;  %1302 = vmatpush.bf16.msra.mxu2 %v1276_v1  ;;  %v1263_v9 = vld [vmem:[%s1891_s0 + $0x98] sm:$0xff]  ;;  %v1256_v11 = vld [vmem:[%s1891_s0 + $0x60] sm:$0xff]  ;;  %v1269_v12 = vld [vmem:[%s1891_s0 + $0xc8] sm:$0xff] }
   0x8   :  { %v1264_v13 = vld [vmem:[%s1891_s0 + $0xa0] sm:$0xff]  ;;  %v1247_v14 = vld [vmem:[%s1891_s0 + $0x18] sm:$0xff]  ;;  %v1257_v15 = vld [vmem:[%s1891_s0 + $0x68] sm:$0xff] }
   0x9   :  { %1131 = vmatmul.msk.bf16.vlgmr.msra.gmra.mxu0 %vm268_vm0, %v1244_v2  ;;  %1141 = vmatmul.msk.bf16.vlgmr.msra.gmra.mxu1 %vm268_vm0, %v1254_v3  ;;  %v1270_v16 = vld [vmem:[%s1891_s0 + $0xd0] sm:$0xff]  ;;  %v1265_v17 = vld [vmem:[%s1891_s0 + $0xa8] sm:$0xff]  ;;  %v1248_v18 = vld [vmem:[%s1891_s0 + $0x20] sm:$0xff] }
   0xa   :  { %1154 = vmatmul.msk.bf16.vlgmr.msra.gmra.mxu3 %vm268_vm0, %v1267_v4  ;;  %1149 = vmatmul.msk.bf16.vlgmr.msra.gmra.mxu2 %vm268_vm0, %v1262_v5  ;;  %v1258_v19 = vld [vmem:[%s1891_s0 + $0x70] sm:$0xff]  ;;  %v1271_v20 = vld [vmem:[%s1891_s0 + $0xd8] sm:$0xff]  ;;  %v1249_v21 = vld [vmem:[%s1891_s0 + $0x28] sm:$0xff] }
   0xb   :  { %v1259_v22 = vld [vmem:[%s1891_s0 + $0x78] sm:$0xff]  ;;  %v1272_v23 = vld [vmem:[%s1891_s0 + $0xe0] sm:$0xff]  ;;  %v1266_v24 = vld [vmem:[%s1891_s0 + $0xb0] sm:$0xff] }
   0xc   :  { %v1250_v25 = vld [vmem:[%s1891_s0 + $0x30] sm:$0xff]  ;;  %v1260_v26 = vld [vmem:[%s1891_s0 + $0x80] sm:$0xff]  ;;  %v1273_v27 = vld [vmem:[%s1891_s0 + $0xe8] sm:$0xff] }
   0xd   :  { %v1251_v28 = vld [vmem:[%s1891_s0 + $0x38] sm:$0xff]  ;;  %v1261_v29 = vld [vmem:[%s1891_s0 + $0x88] sm:$0xff]  ;;  %v1274_v30 = vld [vmem:[%s1891_s0 + $0xf0] sm:$0xff] }
   0xe   :  { %v1252_v31 = vld [vmem:[%s1891_s0 + $0x40] sm:$0xff]  ;;  %v1275_v34 = vld [vmem:[%s1891_s0 + $0xf8] sm:$0xff]  ;;  %v1253_v45 = vld [vmem:[%s1891_s0 + $0x48] sm:$0xff] }
  0x19   :  { %1132 = vmatmul.msk.bf16.gmra.mxu0 %vm268_vm0, %v1245_v6  ;;  %1142 = vmatmul.msk.bf16.gmra.mxu1 %vm268_vm0, %v1255_v7 }
  0x1a   :  { %1155 = vmatmul.msk.bf16.gmra.mxu3 %vm268_vm0, %v1268_v8  ;;  %1150 = vmatmul.msk.bf16.gmra.mxu2 %vm268_vm0, %v1263_v9 }
  0x29   :  { %1133 = vmatmul.msk.bf16.gmra.mxu0 %vm268_vm0, %v1246_v10  ;;  %1143 = vmatmul.msk.bf16.gmra.mxu1 %vm268_vm0, %v1256_v11 }
  0x2a   :  { %1156 = vmatmul.msk.bf16.gmra.mxu3 %vm268_vm0, %v1269_v12  ;;  %1151 = vmatmul.msk.bf16.gmra.mxu2 %vm268_vm0, %v1264_v13 }
  0x39   :  { %1134 = vmatmul.msk.bf16.gmra.mxu0 %vm268_vm0, %v1247_v14  ;;  %1144 = vmatmul.msk.bf16.gmra.mxu1 %vm268_vm0, %v1257_v15 }
  0x3a   :  { %1157 = vmatmul.msk.bf16.gmra.mxu3 %vm268_vm0, %v1270_v16  ;;  %1152 = vmatmul.msk.bf16.gmra.mxu2 %vm268_vm0, %v1265_v17 }
  0x49   :  { %1135 = vmatmul.msk.bf16.gmra.mxu0 %vm268_vm0, %v1248_v18  ;;  %1145 = vmatmul.msk.bf16.gmra.mxu1 %vm268_vm0, %v1258_v19  ;;  %v1293_v19 = vld [vmem:[%s1895_s4 + $0x38] sm:$0xff] }
  0x4a   :  { %1158 = vmatmul.msk.bf16.gmra.mxu3 %vm268_vm0, %v1271_v20  ;;  %1153 = vmatmul.msk.bf16.gmra.mxu2 %vm268_vm0, %v1266_v24 }
  0x4b   :  { %840 = vmatpush.bf16.msrb.mxu1 %v1293_v19 }
  0x59   :  { %1136 = vmatmul.msk.bf16.gmra.mxu0 %vm268_vm0, %v1249_v21  ;;  %1146 = vmatmul.msk.bf16.gmra.mxu1 %vm268_vm0, %v1259_v22 }
  0x5a   :  { %1159 = vmatmul.msk.bf16.gmra.mxu3 %vm268_vm0, %v1272_v23 }
  0x69   :  { %1137 = vmatmul.msk.bf16.gmra.mxu0 %vm268_vm0, %v1250_v25  ;;  %1147 = vmatmul.msk.bf16.gmra.mxu1 %vm268_vm0, %v1260_v26 }
  0x6a   :  { %1160 = vmatmul.msk.bf16.gmra.mxu3 %vm268_vm0, %v1273_v27 }
  0x79   :  { %1138 = vmatmul.msk.bf16.gmra.mxu0 %vm268_vm0, %v1251_v28  ;;  %1148 = vmatmul.msk.bf16.gmra.mxu1 %vm268_vm0, %v1261_v29 }
  0x7a   :  { %1161 = vmatmul.msk.bf16.gmra.mxu3 %vm268_vm0, %v1274_v30 }
  0x86   :  { %v374_v32 = vpop.f32.mrf.mxu0  ;;  %v1498_v33 = vpop.f32.mrf.mxu1 }
  0x87   :  { %v534_v38 = vmax.f32 %v374_v32, 0.0  ;;  %v1912_v39 = vmax.f32 %v1498_v33, 0.0 }
  0x89   :  { %1139 = vmatmul.msk.bf16.gmra.mxu0 %vm268_vm0, %v1252_v31 }
  0x8a   :  { %1162 = vmatmul.msk.bf16.gmra.mxu3 %vm268_vm0, %v1275_v34 }
  0x8d   :  { %v1505_v35 = vpop.f32.mrf.mxu3  ;;  %v1556_v18 = vpop.f32.mrf.mxu2 }
  0x8e   :  { %v376_v36 = vpop.f32.mrf.mxu0  ;;  %v1507_v37 = vpop.f32.mrf.mxu1  ;;  %v1920_v44 = vmax.f32 %v1505_v35, 0.0 }
  0x8f   :  { %v535_v40 = vmax.f32 %v376_v36, 0.0  ;;  %v1908_v41 = vmax.f32 %v1507_v37, 0.0 }
  0x91   :  { %v672_v42 = vadd.f32 %v535_v40, %v534_v38  ;;  %v613_v43 = vmax.f32 %v1908_v41, %v1912_v39 }
  0x95   :  { %v1519_v46 = vpop.f32.mrf.mxu3  ;;  %v1568_v28 = vpop.f32.mrf.mxu2 }
  0x96   :  { %v379_v47 = vpop.f32.mrf.mxu0  ;;  %v1521_v48 = vpop.f32.mrf.mxu1  ;;  %v1919_v49 = vmax.f32 %v1519_v46, 0.0 }
  0x97   :  { %v536_v50 = vmax.f32 %v379_v47, 0.0  ;;  %v1906_v51 = vmax.f32 %v1521_v48, 0.0 }
  0x98   :  { %v637_v52 = vmax.f32 %v1919_v49, %v1920_v44 }
  0x99   :  { %v598_v53 = vmax.f32 %v534_v38, %v536_v50  ;;  %v673_v54 = vadd.f32 %v672_v42, %v536_v50  ;;  %v616_v55 = vmax.f32 %v1906_v51, %v613_v43  ;;  %1140 = vmatmul.msk.bf16.gmra.mxu0 %vm268_vm0, %v1253_v45  ;;  %v1292_v42 = vld [vmem:[%s1895_s4 + $0x30] sm:$0xff] }
  0x9a   :  { %841 = vmatpush.bf16.msrb.mxu1 %v1292_v42 }
  0x9d   :  { %v1532_v56 = vpop.f32.mrf.mxu3  ;;  %v1585_v47 = vpop.f32.mrf.mxu2 }
  0x9e   :  { %v381_v57 = vpop.f32.mrf.mxu0  ;;  %v1534_v58 = vpop.f32.mrf.mxu1  ;;  %v1918_v59 = vmax.f32 %v1532_v56, 0.0  ;;  %v1926_v42 = vmax.f32 %v1585_v47, 0.0 }
  0x9f   :  { %v537_v60 = vmax.f32 %v381_v57, 0.0  ;;  %v1905_v61 = vmax.f32 %v1534_v58, 0.0 }
  0xa0   :  { %v639_v62 = vmax.f32 %v637_v52, %v1918_v59 }
  0xa1   :  { %v599_v63 = vmax.f32 %v535_v40, %v537_v60  ;;  %v674_v0 = vadd.f32 %v673_v54, %v537_v60  ;;  %v618_v1 = vmax.f32 %v616_v55, %v1905_v61 }
  0xa5   :  { %v1542_v2 = vpop.f32.mrf.mxu3 }
  0xa6   :  { %v384_v3 = vpop.f32.mrf.mxu0  ;;  %v1544_v4 = vpop.f32.mrf.mxu1  ;;  %v1917_v43 = vmax.f32 %v1542_v2, 0.0 }
  0xa7   :  { %v538_v5 = vmax.f32 %v384_v3, 0.0  ;;  %v1904_v6 = vmax.f32 %v1544_v4, 0.0 }
  0xa8   :  { %v638_v55 = vmax.f32 %v1917_v43, %v639_v62 }
  0xa9   :  { %v600_v7 = vmax.f32 %v598_v53, %v538_v5  ;;  %v675_v8 = vadd.f32 %v674_v0, %v538_v5  ;;  %v620_v9 = vmax.f32 %v618_v1, %v1904_v6 }
  0xad   :  { %v1549_v10 = vpop.f32.mrf.mxu3 }
  0xae   :  { %v386_v11 = vpop.f32.mrf.mxu0  ;;  %v1551_v12 = vpop.f32.mrf.mxu1  ;;  %v1916_v57 = vmax.f32 %v1549_v10, 0.0 }
  0xaf   :  { %v539_v13 = vmax.f32 %v386_v11, 0.0  ;;  %v1903_v14 = vmax.f32 %v1551_v12, 0.0 }
  0xb0   :  { %v640_v3 = vmax.f32 %v638_v55, %v1916_v57 }
  0xb1   :  { %v601_v15 = vmax.f32 %v599_v63, %v539_v13  ;;  %v676_v16 = vadd.f32 %v675_v8, %v539_v13  ;;  %v622_v17 = vmax.f32 %v620_v9, %v1903_v14  ;;  %v1930_v9 = vmax.f32 %v1556_v18, 0.0  ;;  %v1612_v13 = vpop.f32.mrf.mxu2 }
  0xb5   :  { %v1561_v20 = vpop.f32.mrf.mxu3 }
  0xb6   :  { %v389_v21 = vpop.f32.mrf.mxu0  ;;  %v1563_v22 = vpop.f32.mrf.mxu1  ;;  %v1914_v1 = vmax.f32 %v1561_v20, 0.0 }
  0xb7   :  { %v540_v23 = vmax.f32 %v389_v21, 0.0  ;;  %v1902_v24 = vmax.f32 %v1563_v22, 0.0 }
  0xb8   :  { %v641_v62 = vmax.f32 %v1914_v1, %v640_v3 }
  0xb9   :  { %v602_v25 = vmax.f32 %v600_v7, %v540_v23  ;;  %v677_v26 = vadd.f32 %v676_v16, %v540_v23  ;;  %v624_v27 = vmax.f32 %v622_v17, %v1902_v24  ;;  %v1291_v17 = vld [vmem:[%s1895_s4 + $0x28] sm:$0xff]  ;;  %v1928_v23 = vmax.f32 %v1568_v28, 0.0 }
  0xba   :  { %v643_v19 = vmax.f32 %v641_v62, %v1930_v9  ;;  %842 = vmatpush.bf16.msrb.mxu1 %v1291_v17  ;;  %v1285_v62 = vld [vmem:[%s1894_s3 + $0x38] sm:$0xff] }
  0xbb   :  { %908 = vmatpush.bf16.msrb.mxu2 %v1285_v62 }
  0xbd   :  { %v1570_v29 = vpop.f32.mrf.mxu3 }
  0xbe   :  { %v391_v30 = vpop.f32.mrf.mxu0  ;;  %v1572_v31 = vpop.f32.mrf.mxu1 }
  0xbf   :  { %v541_v32 = vmax.f32 %v391_v30, 0.0  ;;  %v1901_v34 = vmax.f32 %v1572_v31, 0.0 }
  0xc1   :  { %v1575_v36 = vmax.f32 %v601_v15, %v541_v32  ;;  %v678_v38 = vadd.f32 %v677_v26, %v541_v32  ;;  %v626_v40 = vmax.f32 %v624_v27, %v1901_v34  ;;  %v1913_v15 = vmax.f32 %v1570_v29, 0.0 }
  0xc3   :  { %v645_v21 = vmax.f32 %v643_v19, %v1913_v15  ;;  %v1923_v19 = vmax.f32 %v1612_v13, 0.0 }
  0xc5   :  { %v1583_v45 = vpop.f32.mrf.mxu3  ;;  %v647_v32 = vmax.f32 %v645_v21, %v1928_v23 }
  0xc6   :  { %v394_v50 = vpop.f32.mrf.mxu0  ;;  %v1587_v52 = vpop.f32.mrf.mxu1  ;;  %v1910_v30 = vmax.f32 %v1583_v45, 0.0 }
  0xc7   :  { %v542_v53 = vmax.f32 %v394_v50, 0.0  ;;  %v1900_v54 = vmax.f32 %v1587_v52, 0.0 }
  0xc9   :  { %v1593_v60 = vmax.f32 %v602_v25, %v542_v53  ;;  %v1595_v63 = vadd.f32 %v678_v38, %v542_v53  ;;  %v615_v0 = vmax.f32 %v1900_v54, %v626_v40  ;;  %v1636_v38 = vpop.f32.mrf.mxu2  ;;  %v649_v40 = vmax.f32 %v647_v32, %v1910_v30 }
  0xcb   :  { %v651_v3 = vmax.f32 %v649_v40, %v1926_v42 }
  0xcd   :  { %v1602_v5 = vpop.f32.mrf.mxu3 }
  0xce   :  { %v1604_v7 = vpop.f32.mrf.mxu0  ;;  %v1606_v8 = vpop.f32.mrf.mxu1  ;;  %v1907_v50 = vmax.f32 %v1602_v5, 0.0 }
  0xcf   :  { %v1899_v11 = vmax.f32 %v1606_v8, 0.0 }
  0xd0   :  { %v653_v17 = vmax.f32 %v651_v3, %v1907_v50  ;;  %v1922_v3 = vmax.f32 %v1636_v38, 0.0 }
  0xd1   :  { %v1617_v16 = vmax.f32 %v615_v0, %v1899_v11  ;;  %v1657_v32 = vpop.f32.mrf.mxu2 }
  0xd2   :  { %v655_v11 = vmax.f32 %v653_v17, %v1923_v19  ;;  %v1921_v17 = vmax.f32 %v1657_v32, 0.0 }
  0xd5   :  { %v1627_v25 = vpop.f32.mrf.mxu3 }
  0xd6   :  { %v1629_v26 = vpop.f32.mrf.mxu0  ;;  %v1631_v27 = vpop.f32.mrf.mxu1  ;;  %v1909_v21 = vmax.f32 %v1627_v25, 0.0 }
  0xd7   :  { %1934 = vst [vmem:[#allocation5_spill] sm:$0xff] %v1631_v27 }
  0xd8   :  { %v657_v24 = vmax.f32 %v655_v11, %v1909_v21 }
  0xd9   :  { %v1674_v61 = vpop.f32.mrf.mxu2 }
  0xda   :  { %v659_v62 = vmax.f32 %v657_v24, %v1922_v3  ;;  %v1924_v30 = vmax.f32 %v1674_v61, 0.0 }
  0xdd   :  { %v1642_v53 = vpop.f32.mrf.mxu3 }
  0xde   :  { %v1644_v55 = vpop.f32.mrf.mxu0  ;;  %v1646_v0 = vpop.f32.mrf.mxu1  ;;  %v1911_v14 = vmax.f32 %v1642_v53, 0.0 }
  0xdf   :  { %v1927_v49 = vmax.f32 %v1644_v55, 0.0 }
  0xe0   :  { %v661_v6 = vmax.f32 %v659_v62, %v1911_v14  ;;  %v1290_v62 = vld [vmem:[%s1895_s4 + $0x20] sm:$0xff]  ;;  %v1284_v14 = vld [vmem:[%s1894_s3 + $0x30] sm:$0xff] }
  0xe1   :  { %v1693_v15 = vpop.f32.mrf.mxu2  ;;  %843 = vmatpush.bf16.msrb.mxu1 %v1290_v62  ;;  %909 = vmatpush.bf16.msrb.mxu2 %v1284_v14  ;;  %v1929_v62 = vmax.f32 %v1631_v27, 0.0 }
  0xe2   :  { %v642_v21 = vmax.f32 %v661_v6, %v1921_v17  ;;  %v577_v14 = vmax.f32 %v1693_v15, 0.0 }
  0xe5   :  { %v1661_v54 = vpop.f32.mrf.mxu3 }
  0xe6   :  { %v1663_v40 = vpop.f32.mrf.mxu0  ;;  %v454_v34 = vpop.f32.mrf.mxu1  ;;  %v1915_v11 = vmax.f32 %v1661_v54, 0.0 }
  0xe7   :  { %v566_v57 = vmax.f32 %v454_v34, 0.0 }
  0xe8   :  { %v644_v24 = vmax.f32 %v642_v21, %v1915_v11  ;;  %v543_v11 = vmax.f32 %v1604_v7, 0.0 }
  0xe9   :  { %v484_v23 = vpop.f32.mrf.mxu2 }
  0xea   :  { %v646_v43 = vmax.f32 %v644_v24, %v1924_v30  ;;  %v605_v19 = vmax.f32 %v1575_v36, %v543_v11 }
  0xec   :  { %v607_v24 = vmax.f32 %v605_v19, %v1927_v49 }
  0xed   :  { %v1676_v51 = vpop.f32.mrf.mxu3 }
  0xee   :  { %v1678_v50 = vpop.f32.mrf.mxu0  ;;  %v456_v41 = vpop.f32.mrf.mxu1  ;;  %v1925_v39 = vmax.f32 %v1676_v51, 0.0 }
  0xef   :  { %v567_v44 = vmax.f32 %v456_v41, 0.0  ;;  %v547_v7 = vmax.f32 %v1678_v50, 0.0  ;;  %v1943_v50 = vmax.f32 %v1505_v35, 0.0 }
  0xf0   :  { %v648_v17 = vmax.f32 %v646_v43, %v1925_v39  ;;  %v619_v43 = vmax.f32 %v1617_v16, %v1929_v62 }
  0xf1   :  { %v709_v30 = vadd.f32 %v567_v44, %v566_v57  ;;  %v609_v19 = vmax.f32 %v607_v24, %v547_v7  ;;  %v1935_v24 = vmax.f32 %v1556_v18, 0.0 }
  0xf5   :  { %v1695_v1 = vpop.f32.mrf.mxu3 }
  0xf6   :  { %v1697_v6 = vpop.f32.mrf.mxu0  ;;  %v459_v21 = vpop.f32.mrf.mxu1  ;;  %v1933_v15 = vmax.f32 %v1695_v1, 0.0 }
  0xf7   :  { %v568_v59 = vmax.f32 %v459_v21, 0.0  ;;  %v1932_v21 = vmax.f32 %v1646_v0, 0.0 }
  0xf9   :  { %v635_v3 = vmax.f32 %v566_v57, %v568_v59  ;;  %v710_v57 = vadd.f32 %v709_v30, %v568_v59  ;;  %v1728_v16 = vmax.f32 %v619_v43, %v1932_v21  ;;  %v1282_v59 = vld [vmem:[%s1894_s3 + $0x20] sm:$0xff]  ;;  %v1937_v21 = vmax.f32 %v1585_v47, 0.0 }
  0xfb   :  { %v650_v34 = vmax.f32 %v648_v17, %v635_v3  ;;  %v1283_v3 = vld [vmem:[%s1894_s3 + $0x28] sm:$0xff] }
  0xfc   :  { %910 = vmatpush.bf16.msrb.mxu2 %v1283_v3  ;;  %v578_v3 = vmax.f32 %v484_v23, 0.0 }
  0xfd   :  { %v1712_v41 = vpop.f32.mrf.mxu3  ;;  %v652_v39 = vmax.f32 %v650_v34, %v577_v14 }
  0xfe   :  { %v1718_v42 = vpop.f32.mrf.mxu0  ;;  %v461_v36 = vpop.f32.mrf.mxu1  ;;  %v594_v18 = vmax.f32 %v1712_v41, 0.0 }
  0xff   :  { %v549_v17 = vmax.f32 %v1718_v42, 0.0  ;;  %v569_v49 = vmax.f32 %v461_v36, 0.0  ;;  %v654_v27 = vmax.f32 %v652_v39, %v1933_v15  ;;  %v1281_v39 = vld [vmem:[%s1894_s3 + $0x18] sm:$0xff]  ;;  %v1947_v42 = vmax.f32 %v1549_v10, 0.0  ;;  %v1288_v10 = vld [vmem:[%s1895_s4 + $0x10] sm:$0xff] }
 0x100   :  { %911 = vmatpush.bf16.msrb.mxu2 %v1282_v59 }
 0x101   :  { %v1732_v34 = vmax.f32 %v609_v19, %v549_v17  ;;  %v636_v62 = vmax.f32 %v567_v44, %v569_v49  ;;  %v711_v9 = vadd.f32 %v710_v57, %v569_v49  ;;  %v1936_v19 = vmax.f32 %v1568_v28, 0.0  ;;  %v1280_v28 = vld [vmem:[%s1894_s3 + $0x10] sm:$0xff] }
 0x103   :  { %v623_v30 = vmax.f32 %v1728_v16, %v1732_v34  ;;  %v712_v43 = vadd.f32 %v711_v9, %v1935_v24  ;;  %v656_v36 = vmax.f32 %v654_v27, %v636_v62  ;;  %v1938_v9 = vmax.f32 %v1612_v13, 0.0  ;;  %v486_v27 = vpop.f32.mrf.mxu2 }
 0x104   :  { %912 = vmatpush.bf16.msrb.mxu2 %v1281_v39  ;;  %v544_v62 = vmax.f32 %v1629_v26, 0.0  ;;  %v1939_v34 = vmax.f32 %v1636_v38, 0.0  ;;  %v680_v24 = vadd.f32 %v1595_v63, %v543_v11  ;;  %v1940_v13 = vmax.f32 %v1657_v32, 0.0  ;;  %v1279_v26 = vld [vmem:[%s1894_s3 + $0x8] sm:$0xff] }
 0x105   :  { %v713_v44 = vadd.f32 %v712_v43, %v1936_v19  ;;  %v1745_v49 = vpop.f32.mrf.mxu3  ;;  %v658_v16 = vmax.f32 %v656_v36, %v578_v3  ;;  %v546_v38 = vmax.f32 %v1663_v40, 0.0  ;;  %v1942_v32 = vmax.f32 %v1644_v55, 0.0  ;;  %v1278_v40 = vld [vmem:[%s1894_s3] sm:$0xff] }
 0x106   :  { %v414_v57 = vpop.f32.mrf.mxu0  ;;  %v681_v19 = vadd.f32 %v680_v24, %v544_v62  ;;  %v606_v63 = vmax.f32 %v1593_v60, %v544_v62  ;;  %v1289_v62 = vld [vmem:[%s1895_s4 + $0x18] sm:$0xff] }
 0x107   :  { %v714_v15 = vadd.f32 %v713_v44, %v1937_v21  ;;  %v660_v47 = vmax.f32 %v658_v16, %v594_v18  ;;  %v579_v21 = vmax.f32 %v486_v27, 0.0  ;;  %v1941_v44 = vmax.f32 %v1674_v61, 0.0  ;;  %844 = vmatpush.bf16.msrb.mxu1 %v1289_v62 }
 0x108   :  { %913 = vmatpush.bf16.msrb.mxu2 %v1280_v28  ;;  %v682_v11 = vadd.f32 %v681_v19, %v1942_v32  ;;  %v608_v61 = vmax.f32 %v606_v63, %v546_v38 }
 0x109   :  { %v715_v23 = vadd.f32 %v714_v15, %v1938_v9  ;;  %v662_v16 = vmax.f32 %v660_v47, %v579_v21  ;;  %v595_v9 = vmax.f32 %v1745_v49, 0.0  ;;  %v550_v47 = vmax.f32 %v414_v57, 0.0 }
 0x10a   :  { %v1969_v49 = vmax.f32 %v1646_v0, 0.0 }
 0x10b   :  { %v716_v59 = vadd.f32 %v715_v23, %v1939_v34  ;;  %v548_v23 = vmax.f32 %v1697_v6, 0.0  ;;  %v683_v34 = vadd.f32 %v682_v11, %v546_v38  ;;  %v663_v24 = vmax.f32 %v595_v9, %v662_v16  ;;  %845 = vmatpush.bf16.msrb.mxu1 %v1288_v10  ;;  %v1294_v10 = vld [vmem:[%s1896_s5] sm:$0xff] }
 0x10c   :  { %914 = vmatpush.bf16.msrb.mxu2 %v1279_v26 }
 0x10d   :  { %v717_v15 = vadd.f32 %v716_v59, %v1940_v13  ;;  %v1766_v43 = vpop.f32.mrf.mxu3  ;;  %v684_v60 = vadd.f32 %v683_v34, %v547_v7  ;;  %v610_v55 = vmax.f32 %v608_v61, %v548_v23  ;;  %v1946_v61 = vmax.f32 %v1542_v2, 0.0 }
 0x10e   :  { %v416_v36 = vpop.f32.mrf.mxu0  ;;  %v596_v28 = vmax.f32 %v1766_v43, 0.0  ;;  %v1950_v2 = vmax.f32 %v1498_v33, 0.0  ;;  %v1954_v33 = vmax.f32 %v1521_v48, 0.0  ;;  %v1286_v48 = vld [vmem:[%s1895_s4] sm:$0xff] }
 0x10f   :  { %v718_v39 = vadd.f32 %v717_v15, %v1941_v44  ;;  %v685_v26 = vadd.f32 %v684_v60, %v548_v23  ;;  %v612_v19 = vmax.f32 %v610_v55, %v550_v47  ;;  %v1944_v44 = vmax.f32 %v1519_v46, 0.0 }
 0x110   :  { %915 = vmatpush.bf16.msrb.mxu2 %v1278_v40  ;;  %v1945_v23 = vmax.f32 %v1532_v56, 0.0 }
 0x111   :  { %v719_v27 = vadd.f32 %v718_v39, %v577_v14  ;;  %v551_v14 = vmax.f32 %v416_v36, 0.0  ;;  %v686_v38 = vadd.f32 %v685_v26, %v549_v17 }
 0x113   :  { %v720_v59 = vadd.f32 %v719_v27, %v578_v3  ;;  %v664_v3 = vmax.f32 %v596_v28, %v663_v24  ;;  %v625_v16 = vmax.f32 %v623_v30, %v551_v14  ;;  %v687_v11 = vadd.f32 %v686_v38, %v550_v47 }
 0x114   :  { %v1948_v30 = vmax.f32 %v1561_v20, 0.0  ;;  %v1952_v20 = vmax.f32 %v1507_v37, 0.0  ;;  %v1955_v37 = vmax.f32 %v1627_v25, 0.0  ;;  %v1959_v25 = vmax.f32 %v1661_v54, 0.0 }
 0x115   :  { %v721_v6 = vadd.f32 %v720_v59, %v579_v21  ;;  %v1790_v13 = vpop.f32.mrf.mxu3  ;;  %v688_v59 = vadd.f32 %v687_v11, %v551_v14  ;;  %v1963_v54 = vmax.f32 %v1695_v1, 0.0 }
 0x116   :  { %v419_v57 = vpop.f32.mrf.mxu0  ;;  %v597_v15 = vmax.f32 %v1790_v13, 0.0 }
 0x117   :  { %v722_v7 = vadd.f32 %v721_v6, %v1943_v50  ;;  %v552_v21 = vmax.f32 %v419_v57, 0.0 }
 0x118   :  { %v665_v36 = vmax.f32 %v597_v15, %v664_v3  ;;  %v1949_v3 = vmax.f32 %v1570_v29, 0.0  ;;  %v1953_v29 = vmax.f32 %v1602_v5, 0.0 }
 0x119   :  { %v723_v39 = vadd.f32 %v722_v7, %v1944_v44  ;;  %v614_v63 = vmax.f32 %v612_v19, %v552_v21  ;;  %v689_v46 = vadd.f32 %v688_v59, %v552_v21  ;;  %v1951_v19 = vmax.f32 %v1583_v45, 0.0  ;;  %v1297_v45 = vld [vmem:[%s1896_s5 + $0x18] sm:$0xff] }
 0x11a   :  { %v666_v32 = vrot.slane %v665_v36, 4  ;;  %969 = vmatpush.bf16.msrb.mxu3 %v1297_v45 }
 0x11b   :  { %v724_v27 = vadd.f32 %v723_v39, %v1945_v23  ;;  %v627_v35 = vmax.f32 %v625_v16, %v614_v63  ;;  %v1287_v39 = vld [vmem:[%s1895_s4 + $0x8] sm:$0xff] }
 0x11c   :  { %v667_v40 = vmax.f32 %v665_v36, %v666_v32  ;;  %v1956_v32 = vmax.f32 %v1534_v58, 0.0  ;;  %846 = vmatpush.bf16.msrb.mxu1 %v1287_v39  ;;  %v1960_v58 = vmax.f32 %v1551_v12, 0.0  ;;  %v1964_v12 = vmax.f32 %v1572_v31, 0.0 }
 0x11d   :  { %v725_v34 = vadd.f32 %v724_v27, %v1946_v61  ;;  %v1957_v27 = vmax.f32 %v1642_v53, 0.0 }
 0x11e   :  { %v668_v24 = vrot.slane %v667_v40, 2  ;;  %v421_v60 = vpop.f32.mrf.mxu0 }
 0x11f   :  { %v726_v17 = vadd.f32 %v725_v34, %v1947_v42  ;;  %v553_v55 = vmax.f32 %v421_v60, 0.0 }
 0x120   :  { %v669_v47 = vmax.f32 %v667_v40, %v668_v24  ;;  %v1958_v40 = vmax.f32 %v1544_v4, 0.0  ;;  %847 = vmatpush.bf16.msrb.mxu1 %v1286_v48  ;;  %v1296_v4 = vld [vmem:[%s1896_s5 + $0x10] sm:$0xff]  ;;  %v921_v48 = vld [vmem:[%s1893_s2] sm:$0x3] }
 0x121   :  { %v727_v6 = vadd.f32 %v726_v17, %v1948_v30  ;;  %v628_v62 = vmax.f32 %v553_v55, %v627_v35  ;;  %v690_v56 = vadd.f32 %v689_v46, %v553_v55  ;;  %v1961_v17 = vmax.f32 %v1676_v51, 0.0  ;;  %970 = vmatpush.bf16.msrb.mxu3 %v1296_v4  ;;  %v1295_v51 = vld [vmem:[%s1896_s5 + $0x8] sm:$0xff] }
 0x122   :  { %v670_v7 = vrot.slane %v669_v47, 1  ;;  %v1962_v55 = vmax.f32 %v1563_v22, 0.0 }
 0x123   :  { %v728_v57 = vadd.f32 %v727_v6, %v1949_v3  ;;  %v691_v26 = vadd.f32 %v690_v56, %v1950_v2  ;;  %v629_v14 = vrot.slane %v628_v62, 4  ;;  %v1965_v3 = vmax.f32 %v1587_v52, 0.0  ;;  %v1967_v52 = vld [vmem:[#allocation5_spill] sm:$0xff] }
 0x124   :  { %v671_v23 = vmax.f32 %v669_v47, %v670_v7 }
 0x125   :  { %v729_v50 = vadd.f32 %v728_v57, %v1951_v19  ;;  %v692_v21 = vadd.f32 %v691_v26, %v1952_v20  ;;  %v630_v36 = vmax.f32 %v628_v62, %v629_v14  ;;  %v1966_v26 = vmax.f32 %v1606_v8, 0.0  ;;  %971 = vmatpush.bf16.msrb.mxu3 %v1295_v51 }
 0x126   :  { %v749_v42 = vpack.c.bf16 %v671_v23, %v671_v23 }
 0x127   :  { %v730_v38 = vadd.f32 %v729_v50, %v1953_v29  ;;  %v693_v44 = vadd.f32 %v692_v21, %v1954_v33  ;;  %v631_v16 = vrot.slane %v630_v36, 2 }
 0x128   :  { %v856_v56 = vunpack.c.l.b16 %v749_v42 }
 0x129   :  { %v731_v63 = vadd.f32 %v730_v38, %v1955_v37  ;;  %v694_v11 = vadd.f32 %v693_v44, %v1956_v32  ;;  %v632_v5 = vmax.f32 %v630_v36, %v631_v16  ;;  %972 = vmatpush.bf16.msrb.mxu3 %v1294_v10 }
 0x12b   :  { %v732_v35 = vadd.f32 %v731_v63, %v1957_v27  ;;  %v695_v61 = vadd.f32 %v694_v11, %v1958_v40  ;;  %v633_v34 = vrot.slane %v632_v5, 1 }
 0x12d   :  { %v733_v59 = vadd.f32 %v732_v35, %v1959_v25  ;;  %v696_v24 = vadd.f32 %v695_v61, %v1960_v58  ;;  %v634_v60 = vmax.f32 %v632_v5, %v633_v34  ;;  %v1305_v25 = vld [vmem:[%s1897_s6] ss:$0 sm:$0xff] }
 0x12f   :  { %v734_v46 = vadd.f32 %v733_v59, %v1961_v17  ;;  %v697_v53 = vadd.f32 %v696_v24, %v1962_v55  ;;  %v748_v30 = vpack.c.bf16 %v634_v60, %v634_v60 }
 0x131   :  { %v735_v6 = vadd.f32 %v734_v46, %v1963_v54  ;;  %v698_v47 = vadd.f32 %v697_v53, %v1964_v12  ;;  %v855_v62 = vunpack.c.l.b16 %v748_v30 }
 0x133   :  { %v736_v22 = vadd.f32 %v735_v6, %v594_v18  ;;  %v699_v57 = vadd.f32 %v698_v47, %v1965_v3  ;;  %v857_v2 = vsel %vm788_vm1, %v856_v56, %v855_v62  ;;  %v1968_v18 = vmax.f32 %v1967_v52, 0.0 }
 0x134   :  { %v858_v1 = vpack.c.b16 %v857_v2, %v857_v2 }
 0x135   :  { %v737_v31 = vadd.f32 %v736_v22, %v595_v9  ;;  %v700_v14 = vadd.f32 %v699_v57, %v1966_v26 }
 0x136   :  { %916 = vmatmul.bf16.vlgmr.msrb.gmra.mxu2 %v858_v1 }
 0x137   :  { %v738_v41 = vadd.f32 %v737_v31, %v596_v28  ;;  %v701_v19 = vadd.f32 %v700_v14, %v1968_v18 }
 0x139   :  { %v739_v50 = vadd.f32 %v738_v41, %v597_v15  ;;  %v702_v9 = vadd.f32 %v701_v19, %v1969_v49 }
 0x13b   :  { %v740_v8 = vrot.slane %v739_v50, 4  ;;  %v703_v7 = vrot.slane %v702_v9, 4 }
 0x13d   :  { %v741_v20 = vadd.f32 %v740_v8, %v739_v50  ;;  %v704_v21 = vadd.f32 %v703_v7, %v702_v9 }
 0x13f   :  { %v742_v36 = vrot.slane %v741_v20, 2  ;;  %v705_v29 = vrot.slane %v704_v21, 2 }
 0x141   :  { %v743_v38 = vadd.f32 %v742_v36, %v741_v20  ;;  %v706_v33 = vadd.f32 %v705_v29, %v704_v21 }
 0x143   :  { %v744_v43 = vrot.slane %v743_v38, 1  ;;  %v707_v28 = vrot.slane %v706_v33, 1 }
 0x145   :  { %v745_v44 = vadd.f32 %v744_v43, %v743_v38  ;;  %v708_v39 = vadd.f32 %v707_v28, %v706_v33 }
 0x147   :  { %v747_v16 = vmul.f32 0.00390625, %v745_v44  ;;  %v746_v45 = vmul.f32 0.00390625, %v708_v39 }
 0x149   :  { %v766_v13 = vpack.c.bf16 %v746_v45, %v746_v45  ;;  %v767_v15 = vpack.c.bf16 %v747_v16, %v747_v16 }
 0x14b   :  { %v786_v37 = vunpack.c.l.b16 %v766_v13  ;;  %v787_v0 = vunpack.c.l.b16 %v767_v15 }
 0x14d   :  { %v789_v63 = vsel %vm788_vm1, %v787_v0, %v786_v37 }
 0x14e   :  { %v790_v32 = vpack.c.b16 %v789_v63, %v789_v63 }
 0x150   :  { %848 = vmatmul.bf16.vlgmr.msrb.gmra.mxu1 %v790_v32 }
 0x1b9   :  { %v917_v11 = vpop.f32.mrf.mxu2 }
 0x1c1   :  { %v919_v5 = vpop.f32.mrf.mxu2 }
 0x1cd   :  { %v849_v23 = vpop.f32.mrf.mxu1 }
 0x1ce   :  { %v918_v27 = vadd.f32 %v917_v11, %v849_v23 }
 0x1d0   :  { %v922_v35 = vadd.f32 %v921_v48, %v918_v27 }
 0x1d2   :  { %v923_v40 = vmax.f32 %v922_v35, 0.0 }
 0x1d4   :  { %v924_v61 = vpack.c.bf16 %v923_v40, %v923_v40 }
 0x1d5   :  { %v851_v34 = vpop.f32.mrf.mxu1 }
 0x1d6   :  { %1243 = vmatmul.msk.bf16.vlgmr.msrb.gmra.mxu3 %vm961_vm2, %v924_v61 }
 0x259   :  { %v974_v59 = vpop.f32.mrf.mxu3 }
 0x25a   :  { %v975_v58 = vadd.f32 %v1305_v25, %v974_v59 }
 0x25c   :  { %978 = vst [vmem:[#allocation2] sm:$0x3] %v975_v58 }
 0x25d   :  { %989 = dma.vmem_to_hbm [thread:$0]  %s985_s12, 32, %s987_s15, [#allocation3]  }
 0x261   :  { %v976_v24 = vpop.f32.mrf.mxu3 }
 0x262   :  { %1330 = dma.done.wait [#allocation3], 32  }
 0x263   :  { %1331 = vsyncadd [#allocation3], 4294967264 }
 0x264   :  { %994 = vsyncpa [#allocation3], 1 }

</bundles_post_ra>
